<compile_context>
chip_gen: v7x
topology: tpu7x:2x2x1
jax: 0.10.0
libtpu: 0.0.40
codegen_flags: <defaults>
</compile_context>

<pallas_src>
import jax
import jax.numpy as jnp
from jax.experimental import pallas as pl
from jax.experimental.pallas import tpu as pltpu


def _mlp_kernel(x_ref, w1_ref, b1_ref, w2_ref, b2_ref, o_ref):
    """One batch tile of the MLP.

    x_ref : (TILE_B, 16) bf16   w1_ref: (16, 30) bf16
    b1_ref: (1, 30)  f32        w2_ref: (1, 30)  f32  (layer-2 weight as a row)
    b2_ref: (1, 1)   f32 SMEM   o_ref : (TILE_B, 1) f32
    """
    # Layer 1 on the MXU: bf16 operands, f32 accumulation.
    h = jnp.dot(x_ref[...], w1_ref[...], preferred_element_type=jnp.float32)
    h = jnp.maximum(h + b1_ref[...], 0.0)                     # bias + ReLU (f32, VPU)
    # Layer 2 (N=1): VPU multiply + cross-lane reduce instead of a 1-lane MXU matmul.
    y = jnp.sum(h * w2_ref[...], axis=-1, keepdims=True) + b2_ref[0, 0]
    o_ref[...] = y.astype(o_ref.dtype)


def _round_up(n, m):
    return ((n + m - 1) // m) * m


def net_forward(x, w1, b1, w2, b2, *, tile_b=4096):
    """x: (B, 16) f32 -> (B, 1) f32, matching Net.forward semantics."""
    B, f_in = x.shape
    hidden = w1.shape[1]

    # Tile the batch; small batches collapse to one full-extent tile.
    tile_b = min(tile_b, _round_up(B, 8))
    num_tiles = _round_up(B, tile_b) // tile_b
    b_pad = num_tiles * tile_b

    x_p = x if b_pad == B else jnp.pad(x, ((0, b_pad - B), (0, 0)))
    x_bf16 = x_p.astype(jnp.bfloat16)                 # halve HBM bytes of the x stream
    w1_bf16 = w1.astype(jnp.bfloat16)
    b1_2d = b1.reshape(1, hidden).astype(jnp.float32)
    w2_row = w2.reshape(1, hidden).astype(jnp.float32)  # (30, 1) column -> (1, 30) row
    b2_2d = b2.reshape(1, 1).astype(jnp.float32)

    flops = 2 * b_pad * f_in * hidden + 4 * b_pad * hidden
    bytes_accessed = (
        b_pad * f_in * 2          # x (bf16)
        + f_in * hidden * 2       # w1 (bf16)
        + hidden * 4 + hidden * 4 + 4  # b1, w2 row, b2 (f32)
        + b_pad * 4               # output (f32)
    )

    out = pl.pallas_call(
        _mlp_kernel,
        out_shape=jax.ShapeDtypeStruct((b_pad, 1), jnp.float32),
        grid=(num_tiles,),
        in_specs=[
            pl.BlockSpec((tile_b, f_in), lambda i: (i, 0)),     # streamed x tiles
            pl.BlockSpec((f_in, hidden), lambda i: (0, 0)),     # resident weights
            pl.BlockSpec((1, hidden), lambda i: (0, 0)),
            pl.BlockSpec((1, hidden), lambda i: (0, 0)),
            pl.BlockSpec(memory_space=pltpu.MemorySpace.SMEM),  # b2 scalar in SMEM
        ],
        out_specs=pl.BlockSpec((tile_b, 1), lambda i: (i, 0)),
        compiler_params=pltpu.CompilerParams(
            dimension_semantics=("parallel",),  # shard batch tiles across TCs on v7x
        ),
        cost_estimate=pl.CostEstimate(
            flops=flops, transcendentals=0, bytes_accessed=bytes_accessed),
    )(x_bf16, w1_bf16, b1_2d, w2_row, b2_2d)

    return out[:B]


def init_params(key):
    """Deterministic init mirroring nn.Linear's U(-1/sqrt(fan_in), 1/sqrt(fan_in))."""
    k1, k2, k3, k4 = jax.random.split(key, 4)
    bound1 = 1.0 / jnp.sqrt(16.0)
    bound2 = 1.0 / jnp.sqrt(30.0)
    # Stored as (in_features, out_features) — transpose of PyTorch layout.
    w1 = jax.random.uniform(k1, (16, 30), jnp.float32, -bound1, bound1)
    b1 = jax.random.uniform(k2, (30,), jnp.float32, -bound1, bound1)
    w2 = jax.random.uniform(k3, (30, 1), jnp.float32, -bound2, bound2)
    b2 = jax.random.uniform(k4, (1,), jnp.float32, -bound2, bound2)
    return w1, b1, w2, b2


def _reference(x, w1, b1, w2, b2):
    # Matches the kernel's numerics: x/w1 quantized to bf16, math in f32.
    xq = x.astype(jnp.bfloat16).astype(jnp.float32)
    w1q = w1.astype(jnp.bfloat16).astype(jnp.float32)
    h = jnp.maximum(xq @ w1q + b1, 0.0)
    return h @ w2 + b2


if __name__ == "__main__":
    key = jax.random.PRNGKey(0)
    kx, kp, kx2 = jax.random.split(key, 3)
    w1, b1, w2, b2 = init_params(kp)

    # Small-batch check (single full-extent tile).
    batch = 8
    x = jax.random.normal(kx, (batch, 16), jnp.float32)
    out = jax.block_until_ready(net_forward(x, w1, b1, w2, b2))
    assert out.shape == (batch, 1)
    assert jnp.allclose(out, _reference(x, w1, b1, w2, b2), atol=1e-4, rtol=1e-4)

    # Multi-tile + padding check (exercises the batch grid path).
    batch2 = 5000
    x2 = jax.random.normal(kx2, (batch2, 16), jnp.float32)
    out2 = jax.block_until_ready(net_forward(x2, w1, b1, w2, b2))
    assert out2.shape == (batch2, 1)
    assert jnp.allclose(out2, _reference(x2, w1, b1, w2, b2), atol=1e-4, rtol=1e-4)

    print("KERNEL_OK")
</pallas_src>

<mosaic_0001>
module attributes {stable_mosaic.version = 11 : i64} {
  func.func @_mlp_kernel(%arg0: i32, %arg1: memref<8x16xbf16, #tpu.memory_space<vmem>>, %arg2: memref<16x30xbf16, #tpu.memory_space<vmem>>, %arg3: memref<1x30xf32, #tpu.memory_space<vmem>>, %arg4: memref<1x30xf32, #tpu.memory_space<vmem>>, %arg5: memref<1x1xf32, #tpu.memory_space<smem>>, %arg6: memref<8x1xf32, #tpu.memory_space<vmem>>) attributes {dimension_semantics = [#tpu.dimension_semantics<parallel>], iteration_bounds = array<i64: 1>, scalar_prefetch = 0 : i64, scratch_operands = 0 : i64, tpu.core_type = #tpu.core_type<tc>, window_params = [{transform_indices = @transform_0, window_bounds = array<i64: 8, 16>}, {pipeline_mode = #tpu.pipeline_mode<synchronous>, transform_indices = @transform_1, window_bounds = array<i64: 16, 30>}, {pipeline_mode = #tpu.pipeline_mode<synchronous>, transform_indices = @transform_2, window_bounds = array<i64: 1, 30>}, {pipeline_mode = #tpu.pipeline_mode<synchronous>, transform_indices = @transform_3, window_bounds = array<i64: 1, 30>}, {transform_indices = @transform_4, window_bounds = array<i64: 1, 1>}, {transform_indices = @transform_5, window_bounds = array<i64: 8, 1>}]} {
    %c0 = arith.constant 0 : index
    %c0_0 = arith.constant 0 : index
    %0 = vector.load %arg1[%c0, %c0_0] : memref<8x16xbf16, #tpu.memory_space<vmem>>, vector<8x16xbf16>
    %c0_1 = arith.constant 0 : index
    %c0_2 = arith.constant 0 : index
    %1 = vector.load %arg2[%c0_1, %c0_2] : memref<16x30xbf16, #tpu.memory_space<vmem>>, vector<16x30xbf16>
    %cst = arith.constant dense<0.000000e+00> : vector<8x30xf32>
    %2 = tpu.matmul %0, %1, %cst {dimension_numbers = #tpu.dot_dimension_numbers<[1], [0], [0], [1], [0, 0, 1, 1], [], []>} : vector<8x16xbf16>, vector<16x30xbf16>, vector<8x30xf32> -> vector<8x30xf32>
    %c0_3 = arith.constant 0 : index
    %c0_4 = arith.constant 0 : index
    %3 = vector.load %arg3[%c0_3, %c0_4] : memref<1x30xf32, #tpu.memory_space<vmem>>, vector<1x30xf32>
    %4 = vector.broadcast %3 : vector<1x30xf32> to vector<8x30xf32>
    %5 = arith.addf %2, %4 : vector<8x30xf32>
    %cst_5 = arith.constant 0.000000e+00 : f32
    %6 = vector.broadcast %cst_5 : f32 to vector<8x30xf32>
    %7 = arith.maximumf %5, %6 : vector<8x30xf32>
    %c0_6 = arith.constant 0 : index
    %c0_7 = arith.constant 0 : index
    %8 = vector.load %arg4[%c0_6, %c0_7] : memref<1x30xf32, #tpu.memory_space<vmem>>, vector<1x30xf32>
    %9 = vector.broadcast %8 : vector<1x30xf32> to vector<8x30xf32>
    %10 = arith.mulf %7, %9 : vector<8x30xf32>
    %cst_8 = arith.constant dense<0.000000e+00> : vector<8xf32>
    %11 = vector.multi_reduction <add>, %10, %cst_8 [1] : vector<8x30xf32> to vector<8xf32>
    %12 = vector.shape_cast %11 : vector<8xf32> to vector<8x1xf32>
    %c0_9 = arith.constant 0 : index
    %c0_10 = arith.constant 0 : index
    %13 = memref.load %arg5[%c0_9, %c0_10] : memref<1x1xf32, #tpu.memory_space<smem>>
    %14 = vector.broadcast %13 : f32 to vector<8x1xf32>
    %15 = arith.addf %12, %14 : vector<8x1xf32>
    %c0_11 = arith.constant 0 : index
    %c0_12 = arith.constant 0 : index
    %16 = vector.load %arg6[%c0_11, %c0_12] : memref<8x1xf32, #tpu.memory_space<vmem>>, vector<8x1xf32>
    tpu.vector_store %arg6[%c0_11, %c0_12], %15 {strides = array<i32>} : memref<8x1xf32, #tpu.memory_space<vmem>>, vector<8x1xf32>,
    return
  }
  func.func @transform_0(%arg0: i32) -> (i32, i32) {
    %c0_i32 = arith.constant 0 : i32
    %c0_i32_0 = arith.constant 0 : i32
    return %arg0, %c0_i32 : i32, i32
  }
  func.func @transform_1(%arg0: i32) -> (i32, i32) {
    %c0_i32 = arith.constant 0 : i32
    %c0_i32_0 = arith.constant 0 : i32
    %c0_i32_1 = arith.constant 0 : i32
    return %c0_i32, %c0_i32_0 : i32, i32
  }
  func.func @transform_2(%arg0: i32) -> (i32, i32) {
    %c0_i32 = arith.constant 0 : i32
    %c0_i32_0 = arith.constant 0 : i32
    %c0_i32_1 = arith.constant 0 : i32
    return %c0_i32, %c0_i32_0 : i32, i32
  }
  func.func @transform_3(%arg0: i32) -> (i32, i32) {
    %c0_i32 = arith.constant 0 : i32
    %c0_i32_0 = arith.constant 0 : i32
    %c0_i32_1 = arith.constant 0 : i32
    return %c0_i32, %c0_i32_0 : i32, i32
  }
  func.func @transform_4(%arg0: i32) -> (i32, i32) {
    %c0_i32 = arith.constant 0 : i32
    %c0_i32_0 = arith.constant 0 : i32
    %c0_i32_1 = arith.constant 0 : i32
    return %c0_i32, %c0_i32_0 : i32, i32
  }
  func.func @transform_5(%arg0: i32) -> (i32, i32) {
    %c0_i32 = arith.constant 0 : i32
    %c0_i32_0 = arith.constant 0 : i32
    return %arg0, %c0_i32 : i32, i32
  }
}

</mosaic_0001>

<bundles_post_ra>
// kernel: tpu_custom_call.1
= control target key start
LH: loop header
LB: loop body
LE: loop exit
PB: predicated region body
PF: predicated region fallthrough
CT: control target
= control target key end

     0   :  { %11 = vsyncpa [#allocation4], 0  ;;  %s278_s0 = inlined_call_operand.hbm [shape: bf16[8,16], index: 0, kind: input, shape index: {}]   ;;  %s279_s1 = inlined_call_operand.hbm [shape: bf16[16,30], index: 1, kind: input, shape index: {}]   ;;  %s280_s2 = inlined_call_operand.vmem [shape: f32[1,30], index: 2, kind: input, shape index: {}]   ;;  %s281_s3 = inlined_call_operand.vmem [shape: f32[1,30], index: 3, kind: input, shape index: {}]   ;;  %s282_s4 = inlined_call_operand.<no memory space> [shape: f32[1,1], index: 4, kind: input, shape index: {}]   ;;  %s283_s5 = inlined_call_operand.vmem [shape: f32[8,1], index: 5, kind: output, shape index: {}]  }
   0x1   :  { %12 = vsyncpa [#allocation6], 0  ;;  %s199_s18 = smov [#allocation3]   ;;  %s200_s20 = smov [#allocation5]  }
   0x2   :  { %s19_s19 = sshll.u32 %s199_s18, 4  ;;  %s28_s21 = sshll.u32 %s200_s20, 4  ;;  %s20_s19 = int_to_ptr.vmem [resolvable:$true] %s19_s19  ;;  %s235_s21 = int_to_ptr.vmem [resolvable:$true] %s28_s21 }
   0x3   :  { %s151_s24 = scalar_lea.hbm %s278_s0, 64 }
   0x4   :  { %p152_p0 = scmp.ne.s32.totalorder %s278_s0, %s151_s24  ;;  %p155_p1 = scmp.lt.u32.totalorder %s151_s24, %s278_s0 }
   0x6   :  { %p157_p2 = pnand %p155_p1, %p152_p0 }
   0x8   :  { %160 = shalt.err (!%p157_p2)
}
   0x9   :  { %s161_s29 = scalar_lea.vmem %s20_s19, 64  ;;  %p166_p4 = scmp.lt.s32.totalorder %s20_s19, %s20_s19 }
   0xa   :  { %p162_p3 = scmp.ne.s32.totalorder %s20_s19, %s161_s29  ;;  %p167_p5 = scmp.lt.s32.totalorder %s161_s29, %s161_s29 }
   0xc   :  { %p168_p6 = por %p167_p5, %p166_p4 }
   0xe   :  { %p169_p7 = pnand %p168_p6, %p162_p3 }
  0x10   :  { %172 = shalt.err (!%p169_p7)
}
  0x11   :  { %22 = dma.hbm_to_vmem [thread:$0]  %s278_s0, 64, %s20_s19, [#allocation4]  }
  0x12   :  { %s173_s9 = scalar_lea.hbm %s279_s1, 128 }
  0x13   :  { %p174_p8 = scmp.ne.s32.totalorder %s279_s1, %s173_s9  ;;  %p177_p9 = scmp.lt.u32.totalorder %s173_s9, %s279_s1 }
  0x15   :  { %p179_p10 = pnand %p177_p9, %p174_p8 }
  0x17   :  { %182 = shalt.err (!%p179_p10)
}
  0x18   :  { %s183_s14 = scalar_lea.vmem %s235_s21, 128  ;;  %p188_p12 = scmp.lt.s32.totalorder %s235_s21, %s235_s21 }
  0x19   :  { %p184_p11 = scmp.ne.s32.totalorder %s235_s21, %s183_s14  ;;  %p189_p13 = scmp.lt.s32.totalorder %s183_s14, %s183_s14 }
  0x1b   :  { %p190_p0 = por %p189_p13, %p188_p12 }
  0x1d   :  { %p191_p1 = pnand %p190_p0, %p184_p11 }
  0x1f   :  { %194 = shalt.err (!%p191_p1)
}
  0x20   :  { %s201_s0 = smov 64   ;;  %s202_s15 = smov 4  }
  0x21   :  { %34 = dma.hbm_to_vmem [thread:$0]  %s279_s1, 128, %s235_s21, [#allocation6], %s201_s0, %s201_s0, %s202_s15  }
  0x22   :  { %195 = dma.done.wait [#allocation4], 64  }
  0x23   :  { %196 = vsyncadd [#allocation4], 4294967232 }
  0x24   :  { %197 = dma.done.wait [#allocation6], 128  }
  0x25   :  { %198 = vsyncadd [#allocation6], 4294967168  ;;  %v203_v0 = vmov 0.0   ;;  %vm204_vm0 = vmmov 0   ;;  %v150_v1 = vld [vmem:[#allocation5] sm:$0xff]   ;;  %vm64_vm1 = vcmask 130048   ;;  %v122_v13 = vstv %s282_s4 }
  0x26   :  { %138 = vmatprep.subr.bf16.mxu0 %v203_v0  ;;  %140 = vmatprep.mubr.msk.bf16.mxu0 %vm204_vm0, %v203_v0  ;;  %v48_v2 = vld [vmem:[#allocation3] sm:$0xf]  ;;  %vm117_vm2 = vcmask 244736   ;;  %vm124_vm3 = vcmask 7168  }
  0x27   :  { %139 = vmatpush3.bf16.msra.mxu0 %v150_v1  ;;  %v132_v3 = vld [vmem:[%s280_s2] ss:$0 sm:$0xff] }
  0x28   :  { %v135_v8 = vld [vmem:[%s281_s3] ss:$0 sm:$0xff] }
  0x2a   :  { %141 = vmatmul.mubr.msk.bf16.vlgmr.msra.gmra.mrb[0].mxu0 %vm64_vm1, %v48_v2 }
  0xfd   :  { %v102_v4 = vpop.f32.mrb[0].mxu0 }
  0xfe   :  { %v103_v5 = vadd.f32 %v132_v3, %v102_v4  ;;  %v142_v6 = vpop.f32.mrb[1].mxu0 }
  0xff   :  { %v105_v7 = vpop.f32.mrb[2].mxu0 }
 0x100   :  { %v108_v9 = vmax.f32 %v103_v5, 0.0  ;;  %v143_v10 = vpop.f32.mrb[3].mxu0 }
 0x102   :  { %v116_v11 = vmul.f32 %v135_v8, %v108_v9 }
 0x104   :  { %v118_v12 = vsel %vm117_vm2, %v116_v11, 0.0 }
 0x105   :  { %119 = vadd.xlane.f32.xlu0 %v118_v12 }
 0x192   :  { %v120_v14 = vpop.xlane.xlu0 %119 }
 0x193   :  { %v123_v15 = vadd.f32 %v122_v13, %v120_v14 }
 0x195   :  { %125 = vst.msk [vmem:[%s283_s5] sm:$0xff] %vm124_vm3, %v123_v15 }
 0x196   :  { %130 = vsyncpa [#allocation4], 1 }
 0x197   :  { %131 = vsyncpa [#allocation6], 1 }

</bundles_post_ra>
